<compile_context>
chip_gen: v6e
topology: v6e:2x2x1
jax: 0.10.0
libtpu: 0.0.40
codegen_flags: <defaults>
</compile_context>

<pallas_src>
import functools

import jax
import jax.numpy as jnp
import numpy as np
from jax import lax
from jax.experimental import pallas as pl
from jax.experimental.pallas import tpu as pltpu


def rcab_kernel(x_ref, mask_ref, w1_ref, b1_ref, w2_ref, b2_ref,
                caw1_ref, cab1_ref, caw2_ref, cab2_ref,
                o_ref, row_ref, *, width):
    """One grid step: `bt` images, each held as (C, P) with P = H*W on lanes."""
    bt, c, p = x_ref.shape
    padl = width + 1                      # halo lanes on each side of the row

    masks = mask_ref[...]                 # (9, P)  1.0 = tap stays inside image
    w9_1 = w1_ref[...]                    # (C, 9C)
    w9_2 = w2_ref[...]
    b1 = b1_ref[...]                      # (C, 1)
    b2 = b2_ref[...]
    caw1 = caw1_ref[...]                  # (Cr, C)
    cab1 = cab1_ref[...]                  # (Cr, 1)
    caw2 = caw2_ref[...]                  # (C, Cr)
    cab2 = cab2_ref[...]                  # (C, 1)

    def conv3x3(img, w9, bias):
        # Stage the image once in the flat padded row, then read the nine
        # (dy, dx)-shifted copies back as lane-offset windows.  Halo lanes are
        # never zeroed: the where-masks make them dead values.
        row_ref[:, padl:padl + p] = img
        taps = []
        for ky in range(3):
            for kx in range(3):
                d = (ky - 1) * width + (kx - 1)
                win = row_ref[:, padl + d:padl + d + p]          # (C, P)
                m = masks[ky * 3 + kx:ky * 3 + kx + 1, :]        # (1, P)
                taps.append(jnp.where(m > 0.5, win, 0.0))
        x9 = jnp.concatenate(taps, axis=0)                       # (9C, P)
        # Single fused-tap MXU matmul, K = 9C (f32 operands: see header note).
        return jnp.dot(w9, x9, preferred_element_type=jnp.float32) + bias

    for bi in range(bt):                  # static unroll: amortizes grid overhead
        x = x_ref[bi].astype(jnp.float32)                        # (C, P)
        y1 = jnp.maximum(conv3x3(x, w9_1, b1), 0.0)
        y2 = conv3x3(y1, w9_2, b2)

        # channel attention: global avg pool -> 1x1 -> relu -> 1x1 -> sigmoid
        pooled = jnp.mean(y2, axis=1, keepdims=True)             # (C, 1)
        hidden = jnp.maximum(
            jnp.dot(caw1, pooled, preferred_element_type=jnp.float32) + cab1,
            0.0)                                                 # (Cr, 1)
        att = jax.nn.sigmoid(
            jnp.dot(caw2, hidden, preferred_element_type=jnp.float32) + cab2)

        # residual add + lane-dense (C, H*W) store
        o_ref[bi] = (x + y2 * att).astype(o_ref.dtype)


def rcab_forward(x_nchw, params, *, batch_tile=1):
    """x_nchw: (B, C, H, W) float32 (PyTorch layout). Returns (B, C, H, W)."""
    B, C, H, W = x_nchw.shape
    P = H * W
    Cr = params["caw1"].shape[0]
    assert B % batch_tile == 0, (B, batch_tile)

    # ---- glue: layout / weight prep only ----
    x = x_nchw.reshape(B, C, P)                                   # pixels -> lanes
    # fused-tap weights: (C_out, 9*C_in), tap order (ky, kx), channel fastest
    w9_1 = jnp.transpose(params["w1"], (0, 2, 3, 1)).reshape(C, 9 * C)
    w9_2 = jnp.transpose(params["w2"], (0, 2, 3, 1)).reshape(C, 9 * C)
    b1 = params["b1"].reshape(C, 1)
    b2 = params["b2"].reshape(C, 1)
    caw1 = params["caw1"][:, :, 0, 0]                             # (Cr, C)
    caw2 = params["caw2"][:, :, 0, 0]                             # (C, Cr)
    cab1 = params["cab1"].reshape(Cr, 1)
    cab2 = params["cab2"].reshape(C, 1)

    # 0/1 validity mask per (ky, kx) tap: 1 where the shifted pixel stays inside
    # the image (covers both the zero padding and the flat-row wrap-around).
    yy, xx = np.divmod(np.arange(P), W)
    masks = np.zeros((9, P), np.float32)
    for ky in range(3):
        for kx in range(3):
            sy, sx = ky - 1, kx - 1
            ok = ((yy + sy >= 0) & (yy + sy < H) &
                  (xx + sx >= 0) & (xx + sx < W))
            masks[ky * 3 + kx] = ok
    masks = jnp.asarray(masks)

    grid = (B // batch_tile,)
    const = lambda g: (0, 0)
    out = pl.pallas_call(
        functools.partial(rcab_kernel, width=W),
        out_shape=jax.ShapeDtypeStruct((B, C, P), x.dtype),
        grid_spec=pltpu.PrefetchScalarGridSpec(
            num_scalar_prefetch=0,
            grid=grid,
            in_specs=[
                pl.BlockSpec((batch_tile, C, P), lambda g: (g, 0, 0)),   # x
                pl.BlockSpec((9, P), const),                             # masks
                pl.BlockSpec((C, 9 * C), const),                         # w9_1
                pl.BlockSpec((C, 1), const),                             # b1
                pl.BlockSpec((C, 9 * C), const),                         # w9_2
                pl.BlockSpec((C, 1), const),                             # b2
                pl.BlockSpec((Cr, C), const),                            # ca w1
                pl.BlockSpec((Cr, 1), const),                            # ca b1
                pl.BlockSpec((C, Cr), const),                            # ca w2
                pl.BlockSpec((C, 1), const),                             # ca b2
            ],
            out_specs=pl.BlockSpec((batch_tile, C, P), lambda g: (g, 0, 0)),
            # flat padded staging row: image + (W+1) halo lanes on each side
            scratch_shapes=[pltpu.VMEM((C, P + 2 * (W + 1)), jnp.float32)],
        ),
        compiler_params=pltpu.CompilerParams(
            dimension_semantics=("parallel",)),
    )(x, masks, w9_1, b1, w9_2, b2, caw1, cab1, caw2, cab2)

    return out.reshape(B, C, H, W)


def rcab_reference(x, p):
    """Pure-JAX reference matching PyTorch RCAB.forward (NCHW)."""
    dn = lax.conv_dimension_numbers(x.shape, p["w1"].shape,
                                    ("NCHW", "OIHW", "NCHW"))
    y1 = lax.conv_general_dilated(x, p["w1"], (1, 1), "SAME",
                                  dimension_numbers=dn)
    y1 = jnp.maximum(y1 + p["b1"][None, :, None, None], 0.0)
    y2 = lax.conv_general_dilated(y1, p["w2"], (1, 1), "SAME",
                                  dimension_numbers=dn)
    y2 = y2 + p["b2"][None, :, None, None]
    pooled = jnp.mean(y2, axis=(2, 3))                            # (B, C)
    h = jnp.maximum(pooled @ p["caw1"][:, :, 0, 0].T + p["cab1"][None, :], 0.0)
    att = jax.nn.sigmoid(h @ p["caw2"][:, :, 0, 0].T + p["cab2"][None, :])
    return x + y2 * att[:, :, None, None]


def make_params(key, C, reduction=4):
    Cr = C // reduction
    keys = jax.random.split(key, 8)
    scale = 0.1
    return {
        "w1":   scale * jax.random.normal(keys[0], (C, C, 3, 3), jnp.float32),
        "b1":   scale * jax.random.normal(keys[1], (C,), jnp.float32),
        "w2":   scale * jax.random.normal(keys[2], (C, C, 3, 3), jnp.float32),
        "b2":   scale * jax.random.normal(keys[3], (C,), jnp.float32),
        "caw1": scale * jax.random.normal(keys[4], (Cr, C, 1, 1), jnp.float32),
        "cab1": scale * jax.random.normal(keys[5], (Cr,), jnp.float32),
        "caw2": scale * jax.random.normal(keys[6], (C, Cr, 1, 1), jnp.float32),
        "cab2": scale * jax.random.normal(keys[7], (C,), jnp.float32),
    }


if __name__ == "__main__":
    B, C, H, W = 2, 8, 16, 16           # num_features=8, reduction=4 -> Cr=2
    key = jax.random.PRNGKey(0)
    kx, kp = jax.random.split(key)
    x = jax.random.normal(kx, (B, C, H, W), jnp.float32)
    params = make_params(kp, C)

    out = jax.block_until_ready(rcab_forward(x, params))
    ref = jax.block_until_ready(rcab_reference(x, params))
    assert out.shape == (B, C, H, W)
    assert jnp.allclose(out, ref, atol=1e-3, rtol=1e-3), (
        float(jnp.max(jnp.abs(out - ref))))

    # Exercise the batch-folding path (>=2 images per grid step, grid stays >=2).
    x4 = jax.random.normal(kx, (4, C, H, W), jnp.float32)
    out4 = jax.block_until_ready(rcab_forward(x4, params, batch_tile=2))
    ref4 = jax.block_until_ready(rcab_reference(x4, params))
    assert jnp.allclose(out4, ref4, atol=1e-3, rtol=1e-3), (
        float(jnp.max(jnp.abs(out4 - ref4))))

    print("KERNEL_OK")
</pallas_src>

<mosaic_0001>
module attributes {stable_mosaic.version = 11 : i64} {
  func.func @rcab_kernel(%arg0: i32, %arg1: memref<1x8x256xf32, #tpu.memory_space<vmem>>, %arg2: memref<9x256xf32, #tpu.memory_space<vmem>>, %arg3: memref<8x72xf32, #tpu.memory_space<vmem>>, %arg4: memref<8x1xf32, #tpu.memory_space<vmem>>, %arg5: memref<8x72xf32, #tpu.memory_space<vmem>>, %arg6: memref<8x1xf32, #tpu.memory_space<vmem>>, %arg7: memref<2x8xf32, #tpu.memory_space<vmem>>, %arg8: memref<2x1xf32, #tpu.memory_space<vmem>>, %arg9: memref<8x2xf32, #tpu.memory_space<vmem>>, %arg10: memref<8x1xf32, #tpu.memory_space<vmem>>, %arg11: memref<1x8x256xf32, #tpu.memory_space<vmem>>, %arg12: memref<8x290xf32, #tpu.memory_space<vmem>>) attributes {dimension_semantics = [#tpu.dimension_semantics<parallel>], iteration_bounds = array<i64: 2>, scalar_prefetch = 0 : i64, scratch_operands = 1 : i64, tpu.core_type = #tpu.core_type<tc>, window_params = [{transform_indices = @transform_0, window_bounds = array<i64: 1, 8, 256>}, {pipeline_mode = #tpu.pipeline_mode<synchronous>, transform_indices = @transform_1, window_bounds = array<i64: 9, 256>}, {pipeline_mode = #tpu.pipeline_mode<synchronous>, transform_indices = @transform_2, window_bounds = array<i64: 8, 72>}, {pipeline_mode = #tpu.pipeline_mode<synchronous>, transform_indices = @transform_3, window_bounds = array<i64: 8, 1>}, {pipeline_mode = #tpu.pipeline_mode<synchronous>, transform_indices = @transform_4, window_bounds = array<i64: 8, 72>}, {pipeline_mode = #tpu.pipeline_mode<synchronous>, transform_indices = @transform_5, window_bounds = array<i64: 8, 1>}, {pipeline_mode = #tpu.pipeline_mode<synchronous>, transform_indices = @transform_6, window_bounds = array<i64: 2, 8>}, {pipeline_mode = #tpu.pipeline_mode<synchronous>, transform_indices = @transform_7, window_bounds = array<i64: 2, 1>}, {pipeline_mode = #tpu.pipeline_mode<synchronous>, transform_indices = @transform_8, window_bounds = array<i64: 8, 2>}, {pipeline_mode = #tpu.pipeline_mode<synchronous>, transform_indices = @transform_9, window_bounds = array<i64: 8, 1>}, {transform_indices = @transform_10, window_bounds = array<i64: 1, 8, 256>}]} {
    %c0 = arith.constant 0 : index
    %c0_0 = arith.constant 0 : index
    %0 = vector.load %arg2[%c0, %c0_0] : memref<9x256xf32, #tpu.memory_space<vmem>>, vector<9x256xf32>
    %c0_1 = arith.constant 0 : index
    %c0_2 = arith.constant 0 : index
    %1 = vector.load %arg3[%c0_1, %c0_2] : memref<8x72xf32, #tpu.memory_space<vmem>>, vector<8x72xf32>
    %c0_3 = arith.constant 0 : index
    %c0_4 = arith.constant 0 : index
    %2 = vector.load %arg5[%c0_3, %c0_4] : memref<8x72xf32, #tpu.memory_space<vmem>>, vector<8x72xf32>
    %c0_5 = arith.constant 0 : index
    %c0_6 = arith.constant 0 : index
    %3 = vector.load %arg4[%c0_5, %c0_6] : memref<8x1xf32, #tpu.memory_space<vmem>>, vector<8x1xf32>
    %c0_7 = arith.constant 0 : index
    %c0_8 = arith.constant 0 : index
    %4 = vector.load %arg6[%c0_7, %c0_8] : memref<8x1xf32, #tpu.memory_space<vmem>>, vector<8x1xf32>
    %c0_9 = arith.constant 0 : index
    %c0_10 = arith.constant 0 : index
    %5 = vector.load %arg7[%c0_9, %c0_10] : memref<2x8xf32, #tpu.memory_space<vmem>>, vector<2x8xf32>
    %c0_11 = arith.constant 0 : index
    %c0_12 = arith.constant 0 : index
    %6 = vector.load %arg8[%c0_11, %c0_12] : memref<2x1xf32, #tpu.memory_space<vmem>>, vector<2x1xf32>
    %c0_13 = arith.constant 0 : index
    %c0_14 = arith.constant 0 : index
    %7 = vector.load %arg9[%c0_13, %c0_14] : memref<8x2xf32, #tpu.memory_space<vmem>>, vector<8x2xf32>
    %c0_15 = arith.constant 0 : index
    %c0_16 = arith.constant 0 : index
    %8 = vector.load %arg10[%c0_15, %c0_16] : memref<8x1xf32, #tpu.memory_space<vmem>>, vector<8x1xf32>
    %c0_17 = arith.constant 0 : index
    %c0_18 = arith.constant 0 : index
    %c0_19 = arith.constant 0 : index
    %9 = vector.load %arg1[%c0_17, %c0_18, %c0_19] : memref<1x8x256xf32, #tpu.memory_space<vmem>>, vector<1x8x256xf32>
    %10 = vector.shape_cast %9 : vector<1x8x256xf32> to vector<8x256xf32>
    %c0_20 = arith.constant 0 : index
    %c17 = arith.constant 17 : index
    %11 = vector.load %arg12[%c0_20, %c17] : memref<8x290xf32, #tpu.memory_space<vmem>>, vector<8x256xf32>
    tpu.vector_store %arg12[%c0_20, %c17], %10 {strides = array<i32>} : memref<8x290xf32, #tpu.memory_space<vmem>>, vector<8x256xf32>,
    %c0_21 = arith.constant 0 : index
    %c0_22 = arith.constant 0 : index
    %12 = vector.load %arg12[%c0_21, %c0_22] : memref<8x290xf32, #tpu.memory_space<vmem>>, vector<8x256xf32>
    %13 = vector.extract_strided_slice %0 {offsets = [0, 0], sizes = [1, 256], strides = [1, 1]} : vector<9x256xf32> to vector<1x256xf32>
    %cst = arith.constant 5.000000e-01 : f32
    %14 = vector.broadcast %cst : f32 to vector<1x256xf32>
    %15 = arith.cmpf ogt, %13, %14 : vector<1x256xf32>
    %cst_23 = arith.constant 0.000000e+00 : f32
    %16 = vector.shape_cast %15 : vector<1x256xi1> to vector<1x256xi1>
    %17 = vector.broadcast %16 : vector<1x256xi1> to vector<8x256xi1>
    %18 = vector.broadcast %cst_23 : f32 to vector<8x256xf32>
    %19 = arith.select %17, %12, %18 : vector<8x256xi1>, vector<8x256xf32>
    %c0_24 = arith.constant 0 : index
    %c1 = arith.constant 1 : index
    %20 = vector.load %arg12[%c0_24, %c1] : memref<8x290xf32, #tpu.memory_space<vmem>>, vector<8x256xf32>
    %21 = vector.extract_strided_slice %0 {offsets = [1, 0], sizes = [1, 256], strides = [1, 1]} : vector<9x256xf32> to vector<1x256xf32>
    %cst_25 = arith.constant 5.000000e-01 : f32
    %22 = vector.broadcast %cst_25 : f32 to vector<1x256xf32>
    %23 = arith.cmpf ogt, %21, %22 : vector<1x256xf32>
    %cst_26 = arith.constant 0.000000e+00 : f32
    %24 = vector.shape_cast %23 : vector<1x256xi1> to vector<1x256xi1>
    %25 = vector.broadcast %24 : vector<1x256xi1> to vector<8x256xi1>
    %26 = vector.broadcast %cst_26 : f32 to vector<8x256xf32>
    %27 = arith.select %25, %20, %26 : vector<8x256xi1>, vector<8x256xf32>
    %c0_27 = arith.constant 0 : index
    %c2 = arith.constant 2 : index
    %28 = vector.load %arg12[%c0_27, %c2] : memref<8x290xf32, #tpu.memory_space<vmem>>, vector<8x256xf32>
    %29 = vector.extract_strided_slice %0 {offsets = [2, 0], sizes = [1, 256], strides = [1, 1]} : vector<9x256xf32> to vector<1x256xf32>
    %cst_28 = arith.constant 5.000000e-01 : f32
    %30 = vector.broadcast %cst_28 : f32 to vector<1x256xf32>
    %31 = arith.cmpf ogt, %29, %30 : vector<1x256xf32>
    %cst_29 = arith.constant 0.000000e+00 : f32
    %32 = vector.shape_cast %31 : vector<1x256xi1> to vector<1x256xi1>
    %33 = vector.broadcast %32 : vector<1x256xi1> to vector<8x256xi1>
    %34 = vector.broadcast %cst_29 : f32 to vector<8x256xf32>
    %35 = arith.select %33, %28, %34 : vector<8x256xi1>, vector<8x256xf32>
    %c0_30 = arith.constant 0 : index
    %c16 = arith.constant 16 : index
    %36 = vector.load %arg12[%c0_30, %c16] : memref<8x290xf32, #tpu.memory_space<vmem>>, vector<8x256xf32>
    %37 = vector.extract_strided_slice %0 {offsets = [3, 0], sizes = [1, 256], strides = [1, 1]} : vector<9x256xf32> to vector<1x256xf32>
    %cst_31 = arith.constant 5.000000e-01 : f32
    %38 = vector.broadcast %cst_31 : f32 to vector<1x256xf32>
    %39 = arith.cmpf ogt, %37, %38 : vector<1x256xf32>
    %cst_32 = arith.constant 0.000000e+00 : f32
    %40 = vector.shape_cast %39 : vector<1x256xi1> to vector<1x256xi1>
    %41 = vector.broadcast %40 : vector<1x256xi1> to vector<8x256xi1>
    %42 = vector.broadcast %cst_32 : f32 to vector<8x256xf32>
    %43 = arith.select %41, %36, %42 : vector<8x256xi1>, vector<8x256xf32>
    %c0_33 = arith.constant 0 : index
    %c17_34 = arith.constant 17 : index
    %44 = vector.load %arg12[%c0_33, %c17_34] : memref<8x290xf32, #tpu.memory_space<vmem>>, vector<8x256xf32>
    %45 = vector.extract_strided_slice %0 {offsets = [4, 0], sizes = [1, 256], strides = [1, 1]} : vector<9x256xf32> to vector<1x256xf32>
    %cst_35 = arith.constant 5.000000e-01 : f32
    %46 = vector.broadcast %cst_35 : f32 to vector<1x256xf32>
    %47 = arith.cmpf ogt, %45, %46 : vector<1x256xf32>
    %cst_36 = arith.constant 0.000000e+00 : f32
    %48 = vector.shape_cast %47 : vector<1x256xi1> to vector<1x256xi1>
    %49 = vector.broadcast %48 : vector<1x256xi1> to vector<8x256xi1>
    %50 = vector.broadcast %cst_36 : f32 to vector<8x256xf32>
    %51 = arith.select %49, %44, %50 : vector<8x256xi1>, vector<8x256xf32>
    %c0_37 = arith.constant 0 : index
    %c18 = arith.constant 18 : index
    %52 = vector.load %arg12[%c0_37, %c18] : memref<8x290xf32, #tpu.memory_space<vmem>>, vector<8x256xf32>
    %53 = vector.extract_strided_slice %0 {offsets = [5, 0], sizes = [1, 256], strides = [1, 1]} : vector<9x256xf32> to vector<1x256xf32>
    %cst_38 = arith.constant 5.000000e-01 : f32
    %54 = vector.broadcast %cst_38 : f32 to vector<1x256xf32>
    %55 = arith.cmpf ogt, %53, %54 : vector<1x256xf32>
    %cst_39 = arith.constant 0.000000e+00 : f32
    %56 = vector.shape_cast %55 : vector<1x256xi1> to vector<1x256xi1>
    %57 = vector.broadcast %56 : vector<1x256xi1> to vector<8x256xi1>
    %58 = vector.broadcast %cst_39 : f32 to vector<8x256xf32>
    %59 = arith.select %57, %52, %58 : vector<8x256xi1>, vector<8x256xf32>
    %c0_40 = arith.constant 0 : index
    %c32 = arith.constant 32 : index
    %60 = vector.load %arg12[%c0_40, %c32] : memref<8x290xf32, #tpu.memory_space<vmem>>, vector<8x256xf32>
    %61 = vector.extract_strided_slice %0 {offsets = [6, 0], sizes = [1, 256], strides = [1, 1]} : vector<9x256xf32> to vector<1x256xf32>
    %cst_41 = arith.constant 5.000000e-01 : f32
    %62 = vector.broadcast %cst_41 : f32 to vector<1x256xf32>
    %63 = arith.cmpf ogt, %61, %62 : vector<1x256xf32>
    %cst_42 = arith.constant 0.000000e+00 : f32
    %64 = vector.shape_cast %63 : vector<1x256xi1> to vector<1x256xi1>
    %65 = vector.broadcast %64 : vector<1x256xi1> to vector<8x256xi1>
    %66 = vector.broadcast %cst_42 : f32 to vector<8x256xf32>
    %67 = arith.select %65, %60, %66 : vector<8x256xi1>, vector<8x256xf32>
    %c0_43 = arith.constant 0 : index
    %c33 = arith.constant 33 : index
    %68 = vector.load %arg12[%c0_43, %c33] : memref<8x290xf32, #tpu.memory_space<vmem>>, vector<8x256xf32>
    %69 = vector.extract_strided_slice %0 {offsets = [7, 0], sizes = [1, 256], strides = [1, 1]} : vector<9x256xf32> to vector<1x256xf32>
    %cst_44 = arith.constant 5.000000e-01 : f32
    %70 = vector.broadcast %cst_44 : f32 to vector<1x256xf32>
    %71 = arith.cmpf ogt, %69, %70 : vector<1x256xf32>
    %cst_45 = arith.constant 0.000000e+00 : f32
    %72 = vector.shape_cast %71 : vector<1x256xi1> to vector<1x256xi1>
    %73 = vector.broadcast %72 : vector<1x256xi1> to vector<8x256xi1>
    %74 = vector.broadcast %cst_45 : f32 to vector<8x256xf32>
    %75 = arith.select %73, %68, %74 : vector<8x256xi1>, vector<8x256xf32>
    %c0_46 = arith.constant 0 : index
    %c34 = arith.constant 34 : index
    %76 = vector.load %arg12[%c0_46, %c34] : memref<8x290xf32, #tpu.memory_space<vmem>>, vector<8x256xf32>
    %77 = vector.extract_strided_slice %0 {offsets = [8, 0], sizes = [1, 256], strides = [1, 1]} : vector<9x256xf32> to vector<1x256xf32>
    %cst_47 = arith.constant 5.000000e-01 : f32
    %78 = vector.broadcast %cst_47 : f32 to vector<1x256xf32>
    %79 = arith.cmpf ogt, %77, %78 : vector<1x256xf32>
    %cst_48 = arith.constant 0.000000e+00 : f32
    %80 = vector.shape_cast %79 : vector<1x256xi1> to vector<1x256xi1>
    %81 = vector.broadcast %80 : vector<1x256xi1> to vector<8x256xi1>
    %82 = vector.broadcast %cst_48 : f32 to vector<8x256xf32>
    %83 = arith.select %81, %76, %82 : vector<8x256xi1>, vector<8x256xf32>
    %84 = tpu.concatenate %19, %27, %35, %43, %51, %59, %67, %75, %83 in 0 : vector<8x256xf32>, vector<8x256xf32>, vector<8x256xf32>, vector<8x256xf32>, vector<8x256xf32>, vector<8x256xf32>, vector<8x256xf32>, vector<8x256xf32>, vector<8x256xf32> -> vector<72x256xf32>
    %cst_49 = arith.constant dense<0.000000e+00> : vector<8x256xf32>
    %85 = tpu.matmul %1, %84, %cst_49 {dimension_numbers = #tpu.dot_dimension_numbers<[1], [0], [0], [1], [0, 0, 1, 1], [], []>} : vector<8x72xf32>, vector<72x256xf32>, vector<8x256xf32> -> vector<8x256xf32>
    %86 = vector.broadcast %3 : vector<8x1xf32> to vector<8x256xf32>
    %87 = arith.addf %85, %86 : vector<8x256xf32>
    %cst_50 = arith.constant 0.000000e+00 : f32
    %88 = vector.broadcast %cst_50 : f32 to vector<8x256xf32>
    %89 = arith.maximumf %87, %88 : vector<8x256xf32>
    %c0_51 = arith.constant 0 : index
    %c17_52 = arith.constant 17 : index
    %90 = vector.load %arg12[%c0_51, %c17_52] : memref<8x290xf32, #tpu.memory_space<vmem>>, vector<8x256xf32>
    tpu.vector_store %arg12[%c0_51, %c17_52], %89 {strides = array<i32>} : memref<8x290xf32, #tpu.memory_space<vmem>>, vector<8x256xf32>,
    %c0_53 = arith.constant 0 : index
    %c0_54 = arith.constant 0 : index
    %91 = vector.load %arg12[%c0_53, %c0_54] : memref<8x290xf32, #tpu.memory_space<vmem>>, vector<8x256xf32>
    %92 = vector.extract_strided_slice %0 {offsets = [0, 0], sizes = [1, 256], strides = [1, 1]} : vector<9x256xf32> to vector<1x256xf32>
    %cst_55 = arith.constant 5.000000e-01 : f32
    %93 = vector.broadcast %cst_55 : f32 to vector<1x256xf32>
    %94 = arith.cmpf ogt, %92, %93 : vector<1x256xf32>
    %cst_56 = arith.constant 0.000000e+00 : f32
    %95 = vector.shape_cast %94 : vector<1x256xi1> to vector<1x256xi1>
    %96 = vector.broadcast %95 : vector<1x256xi1> to vector<8x256xi1>
    %97 = vector.broadcast %cst_56 : f32 to vector<8x256xf32>
    %98 = arith.select %96, %91, %97 : vector<8x256xi1>, vector<8x256xf32>
    %c0_57 = arith.constant 0 : index
    %c1_58 = arith.constant 1 : index
    %99 = vector.load %arg12[%c0_57, %c1_58] : memref<8x290xf32, #tpu.memory_space<vmem>>, vector<8x256xf32>
    %100 = vector.extract_strided_slice %0 {offsets = [1, 0], sizes = [1, 256], strides = [1, 1]} : vector<9x256xf32> to vector<1x256xf32>
    %cst_59 = arith.constant 5.000000e-01 : f32
    %101 = vector.broadcast %cst_59 : f32 to vector<1x256xf32>
    %102 = arith.cmpf ogt, %100, %101 : vector<1x256xf32>
    %cst_60 = arith.constant 0.000000e+00 : f32
    %103 = vector.shape_cast %102 : vector<1x256xi1> to vector<1x256xi1>
    %104 = vector.broadcast %103 : vector<1x256xi1> to vector<8x256xi1>
    %105 = vector.broadcast %cst_60 : f32 to vector<8x256xf32>
    %106 = arith.select %104, %99, %105 : vector<8x256xi1>, vector<8x256xf32>
    %c0_61 = arith.constant 0 : index
    %c2_62 = arith.constant 2 : index
    %107 = vector.load %arg12[%c0_61, %c2_62] : memref<8x290xf32, #tpu.memory_space<vmem>>, vector<8x256xf32>
    %108 = vector.extract_strided_slice %0 {offsets = [2, 0], sizes = [1, 256], strides = [1, 1]} : vector<9x256xf32> to vector<1x256xf32>
    %cst_63 = arith.constant 5.000000e-01 : f32
    %109 = vector.broadcast %cst_63 : f32 to vector<1x256xf32>
    %110 = arith.cmpf ogt, %108, %109 : vector<1x256xf32>
    %cst_64 = arith.constant 0.000000e+00 : f32
    %111 = vector.shape_cast %110 : vector<1x256xi1> to vector<1x256xi1>
    %112 = vector.broadcast %111 : vector<1x256xi1> to vector<8x256xi1>
    %113 = vector.broadcast %cst_64 : f32 to vector<8x256xf32>
    %114 = arith.select %112, %107, %113 : vector<8x256xi1>, vector<8x256xf32>
    %c0_65 = arith.constant 0 : index
    %c16_66 = arith.constant 16 : index
    %115 = vector.load %arg12[%c0_65, %c16_66] : memref<8x290xf32, #tpu.memory_space<vmem>>, vector<8x256xf32>
    %116 = vector.extract_strided_slice %0 {offsets = [3, 0], sizes = [1, 256], strides = [1, 1]} : vector<9x256xf32> to vector<1x256xf32>
    %cst_67 = arith.constant 5.000000e-01 : f32
    %117 = vector.broadcast %cst_67 : f32 to vector<1x256xf32>
    %118 = arith.cmpf ogt, %116, %117 : vector<1x256xf32>
    %cst_68 = arith.constant 0.000000e+00 : f32
    %119 = vector.shape_cast %118 : vector<1x256xi1> to vector<1x256xi1>
    %120 = vector.broadcast %119 : vector<1x256xi1> to vector<8x256xi1>
    %121 = vector.broadcast %cst_68 : f32 to vector<8x256xf32>
    %122 = arith.select %120, %115, %121 : vector<8x256xi1>, vector<8x256xf32>
    %c0_69 = arith.constant 0 : index
    %c17_70 = arith.constant 17 : index
    %123 = vector.load %arg12[%c0_69, %c17_70] : memref<8x290xf32, #tpu.memory_space<vmem>>, vector<8x256xf32>
    %124 = vector.extract_strided_slice %0 {offsets = [4, 0], sizes = [1, 256], strides = [1, 1]} : vector<9x256xf32> to vector<1x256xf32>
    %cst_71 = arith.constant 5.000000e-01 : f32
    %125 = vector.broadcast %cst_71 : f32 to vector<1x256xf32>
    %126 = arith.cmpf ogt, %124, %125 : vector<1x256xf32>
    %cst_72 = arith.constant 0.000000e+00 : f32
    %127 = vector.shape_cast %126 : vector<1x256xi1> to vector<1x256xi1>
    %128 = vector.broadcast %127 : vector<1x256xi1> to vector<8x256xi1>
    %129 = vector.broadcast %cst_72 : f32 to vector<8x256xf32>
    %130 = arith.select %128, %123, %129 : vector<8x256xi1>, vector<8x256xf32>
    %c0_73 = arith.constant 0 : index
    %c18_74 = arith.constant 18 : index
    %131 = vector.load %arg12[%c0_73, %c18_74] : memref<8x290xf32, #tpu.memory_space<vmem>>, vector<8x256xf32>
    %132 = vector.extract_strided_slice %0 {offsets = [5, 0], sizes = [1, 256], strides = [1, 1]} : vector<9x256xf32> to vector<1x256xf32>
    %cst_75 = arith.constant 5.000000e-01 : f32
    %133 = vector.broadcast %cst_75 : f32 to vector<1x256xf32>
    %134 = arith.cmpf ogt, %132, %133 : vector<1x256xf32>
    %cst_76 = arith.constant 0.000000e+00 : f32
    %135 = vector.shape_cast %134 : vector<1x256xi1> to vector<1x256xi1>
    %136 = vector.broadcast %135 : vector<1x256xi1> to vector<8x256xi1>
    %137 = vector.broadcast %cst_76 : f32 to vector<8x256xf32>
    %138 = arith.select %136, %131, %137 : vector<8x256xi1>, vector<8x256xf32>
    %c0_77 = arith.constant 0 : index
    %c32_78 = arith.constant 32 : index
    %139 = vector.load %arg12[%c0_77, %c32_78] : memref<8x290xf32, #tpu.memory_space<vmem>>, vector<8x256xf32>
    %140 = vector.extract_strided_slice %0 {offsets = [6, 0], sizes = [1, 256], strides = [1, 1]} : vector<9x256xf32> to vector<1x256xf32>
    %cst_79 = arith.constant 5.000000e-01 : f32
    %141 = vector.broadcast %cst_79 : f32 to vector<1x256xf32>
    %142 = arith.cmpf ogt, %140, %141 : vector<1x256xf32>
    %cst_80 = arith.constant 0.000000e+00 : f32
    %143 = vector.shape_cast %142 : vector<1x256xi1> to vector<1x256xi1>
    %144 = vector.broadcast %143 : vector<1x256xi1> to vector<8x256xi1>
    %145 = vector.broadcast %cst_80 : f32 to vector<8x256xf32>
    %146 = arith.select %144, %139, %145 : vector<8x256xi1>, vector<8x256xf32>
    %c0_81 = arith.constant 0 : index
    %c33_82 = arith.constant 33 : index
    %147 = vector.load %arg12[%c0_81, %c33_82] : memref<8x290xf32, #tpu.memory_space<vmem>>, vector<8x256xf32>
    %148 = vector.extract_strided_slice %0 {offsets = [7, 0], sizes = [1, 256], strides = [1, 1]} : vector<9x256xf32> to vector<1x256xf32>
    %cst_83 = arith.constant 5.000000e-01 : f32
    %149 = vector.broadcast %cst_83 : f32 to vector<1x256xf32>
    %150 = arith.cmpf ogt, %148, %149 : vector<1x256xf32>
    %cst_84 = arith.constant 0.000000e+00 : f32
    %151 = vector.shape_cast %150 : vector<1x256xi1> to vector<1x256xi1>
    %152 = vector.broadcast %151 : vector<1x256xi1> to vector<8x256xi1>
    %153 = vector.broadcast %cst_84 : f32 to vector<8x256xf32>
    %154 = arith.select %152, %147, %153 : vector<8x256xi1>, vector<8x256xf32>
    %c0_85 = arith.constant 0 : index
    %c34_86 = arith.constant 34 : index
    %155 = vector.load %arg12[%c0_85, %c34_86] : memref<8x290xf32, #tpu.memory_space<vmem>>, vector<8x256xf32>
    %156 = vector.extract_strided_slice %0 {offsets = [8, 0], sizes = [1, 256], strides = [1, 1]} : vector<9x256xf32> to vector<1x256xf32>
    %cst_87 = arith.constant 5.000000e-01 : f32
    %157 = vector.broadcast %cst_87 : f32 to vector<1x256xf32>
    %158 = arith.cmpf ogt, %156, %157 : vector<1x256xf32>
    %cst_88 = arith.constant 0.000000e+00 : f32
    %159 = vector.shape_cast %158 : vector<1x256xi1> to vector<1x256xi1>
    %160 = vector.broadcast %159 : vector<1x256xi1> to vector<8x256xi1>
    %161 = vector.broadcast %cst_88 : f32 to vector<8x256xf32>
    %162 = arith.select %160, %155, %161 : vector<8x256xi1>, vector<8x256xf32>
    %163 = tpu.concatenate %98, %106, %114, %122, %130, %138, %146, %154, %162 in 0 : vector<8x256xf32>, vector<8x256xf32>, vector<8x256xf32>, vector<8x256xf32>, vector<8x256xf32>, vector<8x256xf32>, vector<8x256xf32>, vector<8x256xf32>, vector<8x256xf32> -> vector<72x256xf32>
    %cst_89 = arith.constant dense<0.000000e+00> : vector<8x256xf32>
    %164 = tpu.matmul %2, %163, %cst_89 {dimension_numbers = #tpu.dot_dimension_numbers<[1], [0], [0], [1], [0, 0, 1, 1], [], []>} : vector<8x72xf32>, vector<72x256xf32>, vector<8x256xf32> -> vector<8x256xf32>
    %165 = vector.broadcast %4 : vector<8x1xf32> to vector<8x256xf32>
    %166 = arith.addf %164, %165 : vector<8x256xf32>
    %cst_90 = arith.constant dense<0.000000e+00> : vector<8xf32>
    %167 = vector.multi_reduction <add>, %166, %cst_90 [1] : vector<8x256xf32> to vector<8xf32>
    %168 = vector.shape_cast %167 : vector<8xf32> to vector<8x1xf32>
    %cst_91 = arith.constant 2.560000e+02 : f32
    %169 = vector.broadcast %cst_91 : f32 to vector<8x1xf32>
    %170 = arith.divf %168, %169 : vector<8x1xf32>
    %cst_92 = arith.constant dense<0.000000e+00> : vector<2x1xf32>
    %171 = tpu.matmul %5, %170, %cst_92 {dimension_numbers = #tpu.dot_dimension_numbers<[1], [0], [0], [1], [0, 0, 1, 1], [], []>} : vector<2x8xf32>, vector<8x1xf32>, vector<2x1xf32> -> vector<2x1xf32>
    %172 = arith.addf %171, %6 : vector<2x1xf32>
    %cst_93 = arith.constant 0.000000e+00 : f32
    %173 = vector.broadcast %cst_93 : f32 to vector<2x1xf32>
    %174 = arith.maximumf %172, %173 : vector<2x1xf32>
    %cst_94 = arith.constant dense<0.000000e+00> : vector<8x1xf32>
    %175 = tpu.matmul %7, %174, %cst_94 {dimension_numbers = #tpu.dot_dimension_numbers<[1], [0], [0], [1], [0, 0, 1, 1], [], []>} : vector<8x2xf32>, vector<2x1xf32>, vector<8x1xf32> -> vector<8x1xf32>
    %176 = arith.addf %175, %8 : vector<8x1xf32>
    %177 = arith.negf %176 : vector<8x1xf32>
    %178 = math.exp %177 : vector<8x1xf32>
    %cst_95 = arith.constant 1.000000e+00 : f32
    %179 = vector.broadcast %cst_95 : f32 to vector<8x1xf32>
    %180 = arith.addf %179, %178 : vector<8x1xf32>
    %181 = arith.divf %179, %180 : vector<8x1xf32>
    %182 = vector.broadcast %181 : vector<8x1xf32> to vector<8x256xf32>
    %183 = arith.mulf %166, %182 : vector<8x256xf32>
    %184 = arith.addf %10, %183 : vector<8x256xf32>
    %c0_96 = arith.constant 0 : index
    %c0_97 = arith.constant 0 : index
    %c0_98 = arith.constant 0 : index
    %185 = vector.load %arg11[%c0_96, %c0_97, %c0_98] : memref<1x8x256xf32, #tpu.memory_space<vmem>>, vector<1x8x256xf32>
    %186 = vector.shape_cast %185 : vector<1x8x256xf32> to vector<8x256xf32>
    %187 = vector.shape_cast %184 : vector<8x256xf32> to vector<1x8x256xf32>
    tpu.vector_store %arg11[%c0_96, %c0_97, %c0_98], %187 {strides = array<i32>} : memref<1x8x256xf32, #tpu.memory_space<vmem>>, vector<1x8x256xf32>,
    return
  }
  func.func @transform_0(%arg0: i32) -> (i32, i32, i32) {
    %c0_i32 = arith.constant 0 : i32
    %c0_i32_0 = arith.constant 0 : i32
    %c0_i32_1 = arith.constant 0 : i32
    return %arg0, %c0_i32, %c0_i32_0 : i32, i32, i32
  }
  func.func @transform_1(%arg0: i32) -> (i32, i32) {
    %c0_i32 = arith.constant 0 : i32
    %c0_i32_0 = arith.constant 0 : i32
    %c0_i32_1 = arith.constant 0 : i32
    return %c0_i32, %c0_i32_0 : i32, i32
  }
  func.func @transform_2(%arg0: i32) -> (i32, i32) {
    %c0_i32 = arith.constant 0 : i32
    %c0_i32_0 = arith.constant 0 : i32
    %c0_i32_1 = arith.constant 0 : i32
    return %c0_i32, %c0_i32_0 : i32, i32
  }
  func.func @transform_3(%arg0: i32) -> (i32, i32) {
    %c0_i32 = arith.constant 0 : i32
    %c0_i32_0 = arith.constant 0 : i32
    %c0_i32_1 = arith.constant 0 : i32
    return %c0_i32, %c0_i32_0 : i32, i32
  }
  func.func @transform_4(%arg0: i32) -> (i32, i32) {
    %c0_i32 = arith.constant 0 : i32
    %c0_i32_0 = arith.constant 0 : i32
    %c0_i32_1 = arith.constant 0 : i32
    return %c0_i32, %c0_i32_0 : i32, i32
  }
  func.func @transform_5(%arg0: i32) -> (i32, i32) {
    %c0_i32 = arith.constant 0 : i32
    %c0_i32_0 = arith.constant 0 : i32
    %c0_i32_1 = arith.constant 0 : i32
    return %c0_i32, %c0_i32_0 : i32, i32
  }
  func.func @transform_6(%arg0: i32) -> (i32, i32) {
    %c0_i32 = arith.constant 0 : i32
    %c0_i32_0 = arith.constant 0 : i32
    %c0_i32_1 = arith.constant 0 : i32
    return %c0_i32, %c0_i32_0 : i32, i32
  }
  func.func @transform_7(%arg0: i32) -> (i32, i32) {
    %c0_i32 = arith.constant 0 : i32
    %c0_i32_0 = arith.constant 0 : i32
    %c0_i32_1 = arith.constant 0 : i32
    return %c0_i32, %c0_i32_0 : i32, i32
  }
  func.func @transform_8(%arg0: i32) -> (i32, i32) {
    %c0_i32 = arith.constant 0 : i32
    %c0_i32_0 = arith.constant 0 : i32
    %c0_i32_1 = arith.constant 0 : i32
    return %c0_i32, %c0_i32_0 : i32, i32
  }
  func.func @transform_9(%arg0: i32) -> (i32, i32) {
    %c0_i32 = arith.constant 0 : i32
    %c0_i32_0 = arith.constant 0 : i32
    %c0_i32_1 = arith.constant 0 : i32
    return %c0_i32, %c0_i32_0 : i32, i32
  }
  func.func @transform_10(%arg0: i32) -> (i32, i32, i32) {
    %c0_i32 = arith.constant 0 : i32
    %c0_i32_0 = arith.constant 0 : i32
    %c0_i32_1 = arith.constant 0 : i32
    return %arg0, %c0_i32, %c0_i32_0 : i32, i32, i32
  }
}

</mosaic_0001>

<bundles_post_ra>
// kernel: tpu_custom_call.1
= control target key start
LH: loop header
LB: loop body
LE: loop exit
PB: predicated region body
PF: predicated region fallthrough
CT: control target
= control target key end

     0   :  { %15 = vsyncpa [#allocation4], 0  ;;  %s2019_s0 = inlined_call_operand.vmem [shape: f32[2,8,256], index: 0, kind: input, shape index: {}]   ;;  %s2020_s1 = inlined_call_operand.hbm [shape: f32[9,256], index: 1, kind: input, shape index: {}]   ;;  %s2021_s2 = inlined_call_operand.vmem [shape: f32[8,72], index: 2, kind: input, shape index: {}]   ;;  %s2022_s3 = inlined_call_operand.vmem [shape: f32[8,1], index: 3, kind: input, shape index: {}]   ;;  %s2023_s4 = inlined_call_operand.hbm [shape: f32[8,72], index: 4, kind: input, shape index: {}]   ;;  %s2024_s5 = inlined_call_operand.vmem [shape: f32[8,1], index: 5, kind: input, shape index: {}]   ;;  %s2025_s6 = inlined_call_operand.vmem [shape: f32[2,8], index: 6, kind: input, shape index: {}]   ;;  %s2026_s7 = inlined_call_operand.vmem [shape: f32[2,1], index: 7, kind: input, shape index: {}]   ;;  %s2027_s8 = inlined_call_operand.vmem [shape: f32[8,2], index: 8, kind: input, shape index: {}]   ;;  %s2028_s9 = inlined_call_operand.vmem [shape: f32[8,1], index: 9, kind: input, shape index: {}]   ;;  %s2029_s10 = inlined_call_operand.hbm [shape: f32[2,8,256], index: 10, kind: output, shape index: {}]  }
   0x1   :  { %16 = vsyncpa [#allocation7], 0 }
   0x2   :  { %17 = vsyncpa [#allocation5], 0 }
   0x3   :  { %19 = vsyncpa [#allocation5 + $0x1], 0  ;;  %s1521_s13 = smov 0   ;;  %s1523_s14 = smov 0  }
   0x4   :  { %s1525_s15 = smov 0   ;;  %s1527_s16 = smov 0  }
   0x5 LB: > { %s1542_s17 = sadd.s32 4294967295, %s1447_s16   ;;  %s1174_s18 = sadd.s32 4294967294, %s1447_s16   ;;  %s1447_s16 = sphi %s1527_s16, %s2083_s16   ;;  %s1443_s15 = sphi %s1525_s15, %s2082_s15   ;;  %s1439_s14 = sphi %s1523_s14, %s2081_s14   ;;  %s1435_s13 = sphi %s1521_s13, %s2080_s13  }
   0x6   : > { %s1546_s19 = sadd.s32 1, %s1447_s16   ;;  %s247_s20 = sadd.s32 1, %s1443_s15 }
   0x7   : > { %s244_s21 = ssub.s32 %s1447_s16, %s1546_s19  ;;  %p257_p0 = scmp.ne.s32.totalorder %s1443_s15, %s1439_s14 }
   0x8   : > { %p245_p1 = scmp.eq.s32.totalorder %s244_s21, 0  ;;  %p258_p2 = scmp.eq.s32.totalorder %s1542_s17, 1 }
   0x9   : > { %p263_p3 = scmp.ne.s32.totalorder %s1439_s14, %s1435_s13  ;;  %p264_p4 = scmp.eq.s32.totalorder %s1174_s18, 1 }
   0xa   : > { %s1557_s22 = scalar_select %p245_p1, %s1443_s15, %s247_s20  }
   0xb   : > { %p1559_p5 = por %p258_p2, %p257_p0  ;;  %p1563_p6 = por %p264_p4, %p263_p3 }
   0xc   : > { %p1175_p7 = scmp.ge.s32.totalorder %s1447_s16, 1  ;;  %p271_p8 = scmp.lt.s32.totalorder %s1447_s16, 3 }
   0xd   : > { %s2046_s24 = scalar_select %p1563_p6, 1, 0 }
   0xe   : > { %p2030_p9 = scmp.eq.s32.totalorder %s1542_s17, 0  ;;  %p1570_p10 = pnand %p1175_p7, %p271_p8 }
   0xf   : > { %s1449_s26 = smov [#allocation3]   ;;  %s1450_s29 = smov [#allocation6]  }
  0x10   : > { %s283_s27 = sshll.u32 %s1449_s26, 4  ;;  %p1258_p11 = pneg %p1570_p10  ;;  %s284_s27 = int_to_ptr.vmem [resolvable:$true] %s283_s27 }
  0x11   : > { %s303_s30 = sshll.u32 %s1450_s29, 4  ;;  %s1338_s11 = scalar_lea.vmem %s284_s27, 512  ;;  %s304_s30 = int_to_ptr.vmem [resolvable:$true] %s303_s30 }
  0x12   : > { %p1578_p12 = pnand %p2030_p9, %p1258_p11  ;;  %p1339_p0 = scmp.ne.s32.totalorder %s284_s27, %s1338_s11 }
  0x13   : > { %p1346_p3 = scmp.lt.s32.totalorder %s284_s27, %s284_s27  ;;  %p1347_p4 = scmp.lt.s32.totalorder %s1338_s11, %s1338_s11 }
  0x14   : > { %p1329_p13 = pneg %p1578_p12 }
  0x15   : > { %p1348_p7 = por %p1347_p4, %p1346_p3 }
  0x16   : > { %p1341_p1 = pnand %p1339_p0, %p1329_p13 }
  0x18   : > { %p1342_p2 = pneg %p1341_p1 }
  0x1a   : > { %p1349_p8 = pnand %p1348_p7, %p1342_p2 }
  0x1c   : > { %1352 = shalt.err (!%p1349_p8)
}
  0x1d   : > { %s1451_s12 = smov 256   ;;  %s1452_s18 = smov 16  }
  0x1e   : > { %1261 = dma.hbm_to_vmem [thread:$0]  (!%p1578_p12), %s2020_s1, 512, %s284_s27, [#allocation4], %s1451_s12, %s1451_s12, %s1452_s18  }
  0x1f   : > { %s1364_s26 = scalar_lea.vmem %s304_s30, 128  ;;  %p1372_p9 = scmp.lt.s32.totalorder %s304_s30, %s304_s30 }
  0x20   : > { %p1365_p11 = scmp.ne.s32.totalorder %s304_s30, %s1364_s26  ;;  %p1373_p6 = scmp.lt.s32.totalorder %s1364_s26, %s1364_s26 }
  0x22   : > { %p1367_p0 = pnand %p1365_p11, %p1329_p13  ;;  %p1374_p3 = por %p1373_p6, %p1372_p9 }
  0x24   : > { %p1368_p1 = pneg %p1367_p0 }
  0x26   : > { %p1375_p2 = pnand %p1374_p3, %p1368_p1 }
  0x28   : > { %1378 = shalt.err (!%p1375_p2)
}
  0x29   : > { %1264 = dma.hbm_to_vmem [thread:$0]  (!%p1578_p12), %s2023_s4, 128, %s304_s30, [#allocation7]  }
  0x2a   : > { %339 = sbr.rel (%p1570_p10) target bundleno = 1742 (0x6ce), region = 60  ;;  %p2049_p4 = scmp.eq.s32.totalorder (!%p1570_p10), %s1542_s17, 0 }
  0x2f   : > { %1422 = dma.done.wait (%p2049_p4), [#allocation4], 512   ;;  %p2050_p13 = pmov %p2049_p4 }
  0x30   : > { %p2051_p7 = pmov %p2049_p4 }
  0x31   : > { %1424 = vsyncadd (%p2050_p13), [#allocation4], 4294966784 }
  0x32   : > { %1426 = dma.done.wait (%p2051_p7), [#allocation7], 128   ;;  %p2052_p6 = pmov %p2049_p4 }
  0x33   : > { %p381_p9 = scmp.lt.s32.totalorder %s1542_s17, 1  ;;  %s1453_s18 = smov 17   ;;  %vm411_vm0 = vcmask 1047688   ;;  %vm406_vm1 = vcmask 138240   ;;  %v1459_v6 = vmov 0   ;;  %v1463_v8 = vmov 0.0  }
  0x34   : > { %1428 = vsyncadd (%p2052_p6), [#allocation7], 4294967168  ;;  %s1454_s20 = smov 94   ;;  %s1455_s21 = smov 95   ;;  %1322 = vset.pattern.permute.xlu0 %v1459_v6  ;;  %698 = vmatprep.mubr.f32.mxu0 %v1463_v8  ;;  %v392_v9 = vld [vmem:[%s2022_s3] sm:$0xff]  ;;  %v421_v17 = vlaneseq  ;;  %v386_v26 = vld [vmem:[#allocation3] sm:$0xff] }
  0x35   : > { %s382_s27 = scalar_select %p381_p9, %s1542_s17, 1  ;;  %896 = vmatprep.mubr.f32.mxu1 %v1463_v8  ;;  %v389_v20 = vld [vmem:[#allocation3 + $0x18] sm:$0x1]  ;;  %v388_v22 = vld [vmem:[#allocation3 + $0x10] sm:$0x1]  ;;  %v387_v25 = vld [vmem:[#allocation3 + $0x8] sm:$0xff] }
  0x36   : > { %s1456_s26 = smov 96   ;;  %s1457_s29 = smov 110   ;;  %v1683_v21 = vshrl.u32 %v421_v17, 7  ;;  %vm599_vm2 = vcmp.gt.f32.partialorder %v389_v20, 0.5  ;;  %vm598_vm3 = vcmp.gt.f32.partialorder %v388_v22, 0.5  ;;  %vm418_vm4 = vcmp.gt.f32.partialorder %v387_v25, 0.5 }
  0x37   : > { %s1232_s28 = sshll.u32 %s382_s27, 4  ;;  %s1458_s11 = smov 111   ;;  %v601_v30 = vsel %vm599_vm2, 1, %v1459_v6  ;;  %v600_v31 = vsel %vm598_vm3, 1, %v1459_v6  ;;  %vm417_vm5 = vcmp.gt.f32.partialorder %v386_v26, 0.5  ;;  %v1700_v35 = vsel %vm418_vm4, 1, %v1459_v6 }
  0x38   : > { %s385_s12 = scalar_lea.vmem %s2019_s0, %s1232_s28  ;;  %s1460_s27 = smov 112   ;;  %v1690_v27 = vsub.s32 0, %v1683_v21  ;;  %v577_v33 = vsub.s32 7, %v1683_v21  ;;  %v554_v37 = vsub.s32 6, %v1683_v21  ;;  %v1704_v38 = vsel %vm417_vm5, 1, %v1459_v6 }
  0x39   : > { %v1615_v0 = vld [vmem:[%s385_s12] sm:$0xff]  ;;  %v1619_v1 = vld [vmem:[%s385_s12 + $0x8] sm:$0xff]  ;;  %s1461_s28 = smov 126   ;;  %s1462_s30 = smov 127   ;;  %vm618_vm6 = vcmask 769024   ;;  %v531_v42 = vsub.s32 5, %v1683_v21 }
  0x3a   : > { %402 = vrot.lane.b32.xlu0 %v1615_v0, %s1453_s18  ;;  %v609_v32 = vrot.slane %v601_v30, %v1690_v27  ;;  %v605_v36 = vrot.slane %v600_v31, %v1690_v27  ;;  %v1711_v41 = vrot.slane %v1700_v35, %v577_v33  ;;  %v1719_v45 = vrot.slane %v1704_v38, %v577_v33  ;;  %v394_v31 = vld [vmem:[%s2025_s6] sm:$0x3]  ;;  %s378_s12 = sand.u32 1, %s1439_s14  }
  0x3b   : > { %v1722_v46 = vrot.slane %v1700_v35, %v554_v37  ;;  %v508_v49 = vsub.s32 4, %v1683_v21  ;;  %vm591_vm9 = vcmask 777216   ;;  %v1730_v50 = vrot.slane %v1704_v38, %v554_v37 }
  0x3c   : > { %vm1706_vm7 = vcmp.eq.s32.totalorder %v609_v32, 1  ;;  %vm1714_vm8 = vcmp.eq.s32.totalorder %v605_v36, 1  ;;  %vm584_vm10 = vcmp.eq.s32.totalorder %v1711_v41, 1  ;;  %v1736_v51 = vrot.slane %v1700_v35, %v531_v42 }
  0x3d   : > { %v485_v52 = vsub.s32 3, %v1683_v21  ;;  %vm2038_vm11 = vcmask 785408   ;;  %vm2032_vm12 = vcmp.eq.s32.totalorder %v1719_v45, 1  ;;  %vm2031_vm13 = vcmp.eq.s32.totalorder %v1722_v46, 1 }
  0x3e   : > { %404 = vrot.lane.b32.xlu0 %v1619_v1, %s1453_s18  ;;  %v1742_v55 = vrot.slane %v1704_v38, %v531_v42  ;;  %v1747_v58 = vrot.slane %v1700_v35, %v508_v49  ;;  %v462_v59 = vsub.s32 2, %v1683_v21  ;;  %vm2035_vm14 = vcmask 900096  }
  0x3f   : > { %vm2033_vm15 = vcmp.eq.s32.totalorder %v1730_v50, 1  ;;  %v1754_v60 = vrot.slane %v1704_v38, %v508_v49  ;;  %vm2034_vm2 = vcmp.eq.s32.totalorder %v1736_v51, 1  ;;  %v1761_v62 = vrot.slane %v1700_v35, %v485_v52 }
  0x40   : > { %v436_v63 = vsub.s32 1, %v1683_v21  ;;  %vm2037_vm3 = vcmask 908288   ;;  %vm2036_vm4 = vcmp.eq.s32.totalorder %v1742_v55, 1  ;;  %vm2039_vm5 = vcmp.eq.s32.totalorder %v1747_v58, 1 }
  0x41   : > { %v424_v26 = vrot.slane %v1704_v38, %v1690_v27 }
  0x42   : > { %v1817_v20 = vrot.slane %v1704_v38, %v436_v63 }
  0xac   : > { %v403_v2 = vpop.permute.xlu0 %402 }
  0xad   : > { %412 = vst.msk [vmem:[#allocation2] sm:$0xff] %vm411_vm0, %v403_v2 }
  0xb0   : > { %v405_v3 = vpop.permute.xlu0 %404 }
  0xb1   : > { %414 = vst.msk [vmem:[#allocation2 + $0x10] sm:$0xff] %vm406_vm1, %v405_v3  ;;  %v1648_v7 = vsel %vm406_vm1, %v403_v2, %v405_v3 }
  0xb4   : > { %v1625_v4 = vld [vmem:[#allocation2] sm:$0xff] }
  0xb5   : > { %612 = vrot.lane.b32.xlu0 %v1625_v4, %s1454_s20 }
  0xb8   : > { %v433_v5 = vld [vmem:[#allocation2 + $0x10] sm:$0xff] }
  0xb9   : > { %589 = vrot.lane.b32.xlu0 %v433_v5, %s1455_s21  ;;  %616 = vrot.lane.b32.xlu1 %v433_v5, %s1454_s20 }
  0xbd   : > { %562 = vrot.lane.b32.xlu0 %v1625_v4, %s1456_s26  ;;  %585 = vrot.lane.b32.xlu1 %v1625_v4, %s1455_s21 }
  0xc1   : > { %543 = vrot.lane.b32.xlu0 %v433_v5, %s1457_s29  ;;  %566 = vrot.lane.b32.xlu1 %v433_v5, %s1456_s26 }
  0xc5   : > { %516 = vrot.lane.b32.xlu0 %v1625_v4, %s1458_s11  ;;  %539 = vrot.lane.b32.xlu1 %v1625_v4, %s1457_s29 }
  0xc9   : > { %497 = vrot.lane.b32.xlu0 %v433_v5, %s1460_s27  ;;  %520 = vrot.lane.b32.xlu1 %v433_v5, %s1458_s11 }
  0xcd   : > { %470 = vrot.lane.b32.xlu0 %v1625_v4, %s1461_s28  ;;  %493 = vrot.lane.b32.xlu1 %v1625_v4, %s1460_s27 }
  0xd1   : > { %474 = vrot.lane.b32.xlu1 %v433_v5, %s1461_s28  ;;  %564 = vrot.lane.b32.xlu0 %v1648_v7, %s1456_s26 }
  0xd5   : > { %518 = vrot.lane.b32.xlu0 %v1648_v7, %s1458_s11  ;;  %614 = vrot.lane.b32.xlu1 %v1648_v7, %s1454_s20 }
  0xd9   : > { %472 = vrot.lane.b32.xlu0 %v1648_v7, %s1461_s28  ;;  %587 = vrot.lane.b32.xlu1 %v1648_v7, %s1455_s21 }
  0xdd   : > { %451 = vrot.lane.b32.xlu0 %v433_v5, %s1462_s30  ;;  %541 = vrot.lane.b32.xlu1 %v1648_v7, %s1457_s29  ;;  %v1770_v5 = vrot.slane %v1704_v38, %v485_v52 }
  0xe1   : > { %495 = vrot.lane.b32.xlu1 %v1648_v7, %s1460_s27  ;;  %627 = vperm.xlu0 %1322, %v392_v9  }
  0xe5   : > { %449 = vrot.lane.b32.xlu1 %v1648_v7, %s1462_s30 }
  0xe9   : > { %447 = vrot.lane.b32.xlu1 %v1625_v4, %s1462_s30 }
 0x127   : > { %v613_v10 = vpop.permute.xlu0 %612 }
 0x12b   : > { %v617_v11 = vpop.permute.xlu1 %616  ;;  %v590_v12 = vpop.permute.xlu0 %589 }
 0x12f   : > { %v586_v13 = vpop.permute.xlu1 %585  ;;  %v1675_v14 = vpop.permute.xlu0 %562 }
 0x133   : > { %v567_v15 = vpop.permute.xlu1 %566  ;;  %v1677_v16 = vpop.permute.xlu0 %543 }
 0x137   : > { %v1679_v18 = vpop.permute.xlu1 %539  ;;  %v1681_v19 = vpop.permute.xlu0 %516 }
 0x13b   : > { %v1685_v23 = vpop.permute.xlu1 %520  ;;  %v1687_v24 = vpop.permute.xlu0 %497 }
 0x13f   : > { %v1692_v28 = vpop.permute.xlu1 %493  ;;  %v1694_v29 = vpop.permute.xlu0 %470 }
 0x143   : > { %v1698_v34 = vpop.permute.xlu1 %474  ;;  %v565_v39 = vpop.permute.xlu0 %564 }
 0x144   : > { %v570_v61 = vsel %vm2038_vm11, %v565_v39, %v567_v15  ;;  %v569_v2 = vsel %vm2038_vm11, %v1675_v14, %v565_v39  ;;  %v1794_v14 = vrot.slane %v1700_v35, %v436_v63 }
 0x147   : > { %v615_v43 = vpop.permute.xlu1 %614  ;;  %v519_v53 = vpop.permute.xlu0 %518 }
 0x148   : > { %v620_v47 = vsel %vm618_vm6, %v615_v43, %v617_v11  ;;  %v619_v48 = vsel %vm618_vm6, %v613_v10, %v615_v43  ;;  %v1780_v10 = vrot.slane %v1700_v35, %v462_v59  ;;  %v523_v15 = vsel %vm2037_vm3, %v1681_v19, %v519_v53 }
 0x149   : > { %1185 = vmatprep.subr.msk.mxu0 %vm1706_vm7, %v620_v47  ;;  %v393_v47 = vld [vmem:[%s2024_s5] sm:$0xff] }
 0x14a   : > { %1186 = vmatpush1.msk.msra.mxu0 %vm1714_vm8, %v619_v48 }
 0x14b   : > { %v588_v54 = vpop.permute.xlu1 %587  ;;  %v473_v11 = vpop.permute.xlu0 %472 }
 0x14c   : > { %v592_v56 = vsel %vm591_vm9, %v586_v13, %v588_v54  ;;  %v593_v57 = vsel %vm591_vm9, %v588_v54, %v590_v12  ;;  %v1786_v12 = vrot.slane %v1704_v38, %v462_v59  ;;  %v524_v13 = vsel %vm2037_vm3, %v519_v53, %v1685_v23 }
 0x14d   : > { %1187 = vmatprep.subr.msk.mxu0 %vm584_vm10, %v593_v57  ;;  %vm453_vm3 = vcmask 1039360  }
 0x14e   : > { %1188 = vmatpush1.msk.msra.mxu0 %vm2032_vm12, %v592_v56  ;;  %vm514_vm12 = vcmp.eq.s32.totalorder %v1754_v60, 1  ;;  %vm468_vm11 = vcmp.eq.s32.totalorder %v1786_v12, 1 }
 0x14f   : > { %v542_v3 = vpop.permute.xlu1 %541  ;;  %1189 = vmatprep.subr.msk.mxu0 %vm2031_vm13, %v570_v61  ;;  %vm499_vm13 = vcmask 916480   ;;  %v452_v22 = vpop.permute.xlu0 %451 }
 0x150   : > { %v546_v6 = vsel %vm2035_vm14, %v1679_v18, %v542_v3  ;;  %v547_v9 = vsel %vm2035_vm14, %v542_v3, %v1677_v16  ;;  %1190 = vmatpush1.msk.msra.mxu0 %vm2033_vm15, %v569_v2  ;;  %vm492_vm15 = vcmp.eq.s32.totalorder %v1761_v62, 1  ;;  %vm2040_vm14 = vcmp.eq.s32.totalorder %v1770_v5, 1 }
 0x151   : > { %1191 = vmatprep.subr.msk.mxu0 %vm2034_vm2, %v547_v9  ;;  %vm2041_vm2 = vcmask 1031168  }
 0x152   : > { %1192 = vmatpush1.msk.msra.mxu0 %vm2036_vm4, %v546_v6  ;;  %vm2042_vm4 = vcmp.eq.s32.totalorder %v1780_v10, 1  ;;  %v478_v19 = vsel %vm2041_vm2, %v473_v11, %v1698_v34  ;;  %v477_v21 = vsel %vm2041_vm2, %v1694_v29, %v473_v11 }
 0x153   : > { %v496_v16 = vpop.permute.xlu1 %495  ;;  %1193 = vmatprep.subr.msk.mxu0 %vm2039_vm5, %v524_v13  ;;  %vm2043_vm5 = vcmp.eq.s32.totalorder %v1794_v14, 1 }
 0x154   : > { %v500_v17 = vsel %vm499_vm13, %v1692_v28, %v496_v16  ;;  %v501_v18 = vsel %vm499_vm13, %v496_v16, %v1687_v24  ;;  %1194 = vmatpush1.msk.msra.mxu0 %vm514_vm12, %v523_v15  ;;  %v428_v24 = vrot.slane %v1700_v35, %v1690_v27  ;;  %v390_v27 = vld [vmem:[%s2021_s2] sm:$0xff] }
 0x155   : > { %1195 = vmatprep.subr.msk.mxu0 %vm492_vm15, %v501_v18 }
 0x156   : > { %1196 = vmatpush1.msk.msra.mxu0 %vm2040_vm14, %v500_v17  ;;  %vm442_vm14 = vcmp.eq.s32.totalorder %v1817_v20, 1  ;;  %vm1833_vm2 = vcmp.eq.s32.totalorder %v428_v24, 1 }
 0x157   : > { %v450_v23 = vpop.permute.xlu1 %449  ;;  %1197 = vmatprep.subr.msk.mxu0 %vm2042_vm4, %v478_v19  ;;  %vm1838_vm4 = vcmp.eq.s32.totalorder %v424_v26, 1 }
 0x158   : > { %v455_v25 = vsel %vm453_vm3, %v450_v23, %v452_v22  ;;  %1198 = vmatpush1.msk.msra.mxu0 %vm468_vm11, %v477_v21 }
 0x159   : > { %1199 = vmatprep.subr.msk.mxu0 %vm2043_vm5, %v455_v25  ;;  %vm2044_vm5 = vcmask 588800  }
 0x15b   : > { %v448_v28 = vpop.permute.xlu1 %447 }
 0x15c   : > { %v454_v30 = vsel %vm453_vm3, %v448_v28, %v450_v23  ;;  %v628_v32 = vpop.permute.xlu0 %627 }
 0x15d   : > { %1200 = vmatpush1.msk.msra.mxu0 %vm442_vm14, %v454_v30 }
 0x15e   : > { %1201 = vmatprep.subr.msk.mxu0 %vm1833_vm2, %v1648_v7 }
 0x15f   : > { %1202 = vmatpush1.msk.msra.mxu0 %vm1838_vm4, %v1625_v4 }
 0x160   : > { %1203 = vmatmul.mubr.msk.f32.vlgmr.msra.gmra.mxu0 %vm2044_vm5, %v390_v27  ;;  %1238 = vmatprep.subr.mxu0 %v1463_v8  ;;  %vm2065_vm5 = vcmask 900096  }
 0x220   : > { %v700_v33 = vpop.f32.mrf.mxu0 }
 0x221   : > { %v701_v34 = vadd.f32 %v700_v33, %v628_v32 }
 0x222   : > { %v702_v35 = vpop.f32.mrf.mxu0 }
 0x223   : > { %v705_v36 = vmax.f32 %v701_v34, 0.0  ;;  %v703_v37 = vadd.f32 %v702_v35, %v628_v32  ;;  %v395_v34 = vld [vmem:[%s2026_s7] sm:$0x3] }
 0x225   : > { %709 = vrot.lane.b32.xlu1 %v705_v36, %s1453_s18  ;;  %v706_v38 = vmax.f32 %v703_v37, 0.0 }
 0x229   : > { %711 = vrot.lane.b32.xlu1 %v706_v38, %s1453_s18  ;;  %s1182_s18 = sshll.u32 %s378_s12, 4 }
 0x297   : > { %v710_v7 = vpop.permute.xlu1 %709 }
 0x298   : > { %717 = vst.msk [vmem:[#allocation2] sm:$0xff] %vm411_vm0, %v710_v7  ;;  %vm2061_vm0 = vcmask 785408  }
 0x29b   : > { %v712_v39 = vpop.permute.xlu1 %711 }
 0x29c   : > { %v1859_v4 = vsel %vm406_vm1, %v710_v7, %v712_v39  ;;  %719 = vst.msk [vmem:[#allocation2 + $0x10] sm:$0xff] %vm406_vm1, %v712_v39  ;;  %vm2062_vm1 = vmmov %vm2061_vm0  ;;  %v397_v7 = vld [vmem:[%s2028_s9] sm:$0xff] }
 0x29f   : > { %v1862_v42 = vld [vmem:[#allocation2] sm:$0xff] }
 0x2a0   : > { %800 = vrot.lane.b32.xlu1 %v1862_v42, %s1455_s21  ;;  %812 = vrot.lane.b32.xlu0 %v1862_v42, %s1454_s20 }
 0x2a3   : > { %v724_v43 = vld [vmem:[#allocation2 + $0x10] sm:$0xff] }
 0x2a4   : > { %776 = vrot.lane.b32.xlu1 %v1862_v42, %s1457_s29  ;;  %788 = vrot.lane.b32.xlu0 %v1862_v42, %s1456_s26 }
 0x2a8   : > { %752 = vrot.lane.b32.xlu1 %v1862_v42, %s1460_s27  ;;  %764 = vrot.lane.b32.xlu0 %v1862_v42, %s1458_s11 }
 0x2ac   : > { %740 = vrot.lane.b32.xlu0 %v1862_v42, %s1461_s28  ;;  %816 = vrot.lane.b32.xlu1 %v724_v43, %s1454_s20 }
 0x2b0   : > { %804 = vrot.lane.b32.xlu0 %v724_v43, %s1455_s21  ;;  %792 = vrot.lane.b32.xlu1 %v724_v43, %s1456_s26 }
 0x2b4   : > { %780 = vrot.lane.b32.xlu0 %v724_v43, %s1457_s29  ;;  %768 = vrot.lane.b32.xlu1 %v724_v43, %s1458_s11 }
 0x2b8   : > { %756 = vrot.lane.b32.xlu0 %v724_v43, %s1460_s27  ;;  %744 = vrot.lane.b32.xlu1 %v724_v43, %s1461_s28 }
 0x2bc   : > { %802 = vrot.lane.b32.xlu1 %v1859_v4, %s1455_s21  ;;  %814 = vrot.lane.b32.xlu0 %v1859_v4, %s1454_s20  ;;  %s1233_s20 = sshll.u32 %s1542_s17, 8  ;;  %s380_s21 = scalar_lea.vmem [#allocation8], %s1182_s18 }
 0x2bd   : > { %s1465_s17 = smov [#allocation8]  }
 0x2be   : > { %s1383_s25 = sshll.u32 %s1465_s17, 4  ;;  %s1384_s25 = int_to_ptr.vmem [resolvable:$false] %s1383_s25 }
 0x2bf   : > { %s1385_s18 = scalar_lea.vmem %s1384_s25, 512 }
 0x2c0   : > { %778 = vrot.lane.b32.xlu1 %v1859_v4, %s1457_s29  ;;  %790 = vrot.lane.b32.xlu0 %v1859_v4, %s1456_s26  ;;  %s1093_s26 = sshll.u32 %s380_s21, 4  ;;  %s1094_s26 = int_to_ptr.vmem [resolvable:$true] %s1093_s26 }
 0x2c1   : > { %p1386_p11 = scmp.lt.s32.totalorder %s1094_s26, %s1384_s25 }
 0x2c4   : > { %754 = vrot.lane.b32.xlu1 %v1859_v4, %s1460_s27  ;;  %766 = vrot.lane.b32.xlu0 %v1859_v4, %s1458_s11  ;;  %s1984_s27 = scalar_lea.hbm %s2029_s10, %s1233_s20 }
 0x2c8   : > { %730 = vrot.lane.b32.xlu1 %v1859_v4, %s1462_s30  ;;  %742 = vrot.lane.b32.xlu0 %v1859_v4, %s1461_s28  ;;  %s1079_s28 = scalar_lea.sflag [#allocation5], %s378_s12 }
 0x2cc   : > { %728 = vrot.lane.b32.xlu1 %v1862_v42, %s1462_s30  ;;  %732 = vrot.lane.b32.xlu0 %v724_v43, %s1462_s30  ;;  %s1379_s30 = scalar_lea.vmem %s1094_s26, 256 }
 0x2cd   : > { %p1380_p10 = scmp.ne.s32.totalorder %s1094_s26, %s1379_s30  ;;  %p1387_p0 = scmp.lt.s32.totalorder %s1385_s18, %s1379_s30 }
 0x2cf   : > { %p1381_p12 = pnand %p1380_p10, %p1559_p5  ;;  %p1388_p1 = por %p1387_p0, %p1386_p11 }
 0x2d0   : > { %826 = vperm.xlu0 %1322, %v393_v47  }
 0x2d1   : > { %p1382_p8 = pneg %p1381_p12 }
 0x2d3   : > { %p1389_p3 = pnand %p1388_p1, %p1382_p8 }
 0x312   : > { %v813_v48 = vpop.permute.xlu0 %812  ;;  %v801_v49 = vpop.permute.xlu1 %800 }
 0x316   : > { %v789_v52 = vpop.permute.xlu0 %788  ;;  %v777_v53 = vpop.permute.xlu1 %776 }
 0x31a   : > { %v765_v54 = vpop.permute.xlu0 %764  ;;  %v753_v56 = vpop.permute.xlu1 %752 }
 0x31e   : > { %v741_v57 = vpop.permute.xlu0 %740  ;;  %v817_v59 = vpop.permute.xlu1 %816 }
 0x322   : > { %v805_v61 = vpop.permute.xlu0 %804  ;;  %v793_v63 = vpop.permute.xlu1 %792 }
 0x326   : > { %v781_v2 = vpop.permute.xlu0 %780  ;;  %v769_v3 = vpop.permute.xlu1 %768 }
 0x32a   : > { %v757_v6 = vpop.permute.xlu0 %756  ;;  %v745_v9 = vpop.permute.xlu1 %744 }
 0x32e   : > { %v815_v11 = vpop.permute.xlu0 %814  ;;  %v803_v13 = vpop.permute.xlu1 %802 }
 0x32f   : > { %v819_v15 = vsel %vm618_vm6, %v815_v11, %v817_v59  ;;  %v818_v16 = vsel %vm618_vm6, %v813_v48, %v815_v11  ;;  %v807_v17 = vsel %vm591_vm9, %v803_v13, %v805_v61  ;;  %v806_v18 = vsel %vm591_vm9, %v801_v49, %v803_v13  ;;  %vm2067_vm9 = vmmov %vm2065_vm5 }
 0x330   : > { %1204 = vmatprep.subr.msk.mxu1 %vm1706_vm7, %v819_v15  ;;  %vm2063_vm6 = vcmp.eq.s32.totalorder %v1719_v45, 1  ;;  %vm2064_vm7 = vcmp.eq.s32.totalorder %v1722_v46, 1 }
 0x331   : > { %1205 = vmatpush1.msk.msra.mxu1 %vm1714_vm8, %v818_v16  ;;  %vm2066_vm8 = vcmp.eq.s32.totalorder %v1730_v50, 1 }
 0x332   : > { %v791_v19 = vpop.permute.xlu0 %790  ;;  %1206 = vmatprep.subr.msk.mxu1 %vm584_vm10, %v807_v17  ;;  %v779_v21 = vpop.permute.xlu1 %778  ;;  %vm2068_vm10 = vcmp.eq.s32.totalorder %v1736_v51, 1 }
 0x333   : > { %v794_v22 = vsel %vm2061_vm0, %v789_v52, %v791_v19  ;;  %v795_v23 = vsel %vm2062_vm1, %v791_v19, %v793_v63  ;;  %1207 = vmatpush1.msk.msra.mxu1 %vm2063_vm6, %v806_v18  ;;  %v783_v40 = vsel %vm2065_vm5, %v779_v21, %v781_v2  ;;  %v782_v44 = vsel %vm2067_vm9, %v777_v53, %v779_v21 }
 0x334   : > { %1208 = vmatprep.subr.msk.mxu1 %vm2064_vm7, %v795_v23  ;;  %vm2069_vm0 = vcmask 908288   ;;  %vm2071_vm6 = vcmp.eq.s32.totalorder %v1742_v55, 1  ;;  %vm2072_vm7 = vcmp.eq.s32.totalorder %v1747_v58, 1  ;;  %vm2073_vm5 = vcmask 1031168  }
 0x335   : > { %1209 = vmatpush1.msk.msra.mxu1 %vm2066_vm8, %v794_v22  ;;  %vm2070_vm1 = vmmov %vm2069_vm0  ;;  %vm2075_vm9 = vcmp.eq.s32.totalorder %v1770_v5, 1  ;;  %v391_v5 = vld [vmem:[#allocation6] sm:$0xff] }
 0x336   : > { %v767_v41 = vpop.permute.xlu0 %766  ;;  %1210 = vmatprep.subr.msk.mxu1 %vm2068_vm10, %v783_v40  ;;  %v755_v24 = vpop.permute.xlu1 %754  ;;  %vm2074_vm8 = vmmov %vm2073_vm5  ;;  %vm2076_vm10 = vcmp.eq.s32.totalorder %v1780_v10, 1 }
 0x337   : > { %v770_v25 = vsel %vm2069_vm0, %v765_v54, %v767_v41  ;;  %v771_v45 = vsel %vm2070_vm1, %v767_v41, %v769_v3  ;;  %1211 = vmatpush1.msk.msra.mxu1 %vm2071_vm6, %v782_v44  ;;  %v759_v46 = vsel %vm499_vm13, %v755_v24, %v757_v6  ;;  %v758_v50 = vsel %vm499_vm13, %v753_v56, %v755_v24 }
 0x338   : > { %1212 = vmatprep.subr.msk.mxu1 %vm2072_vm7, %v771_v45  ;;  %vm1464_vm13 = vmmov 0  }
 0x339   : > { %1213 = vmatpush1.msk.msra.mxu1 %vm514_vm12, %v770_v25  ;;  %vm2077_vm12 = vcmp.eq.s32.totalorder %v1794_v14, 1  ;;  %1240 = vmatprep.mubr.msk.f32.mxu0 %vm1464_vm13, %v1463_v8 }
 0x33a   : > { %v743_v51 = vpop.permute.xlu0 %742  ;;  %1214 = vmatprep.subr.msk.mxu1 %vm492_vm15, %v759_v46  ;;  %v731_v26 = vpop.permute.xlu1 %730  ;;  %vm987_vm15 = vcmask 1041408  }
 0x33b   : > { %v746_v28 = vsel %vm2073_vm5, %v741_v57, %v743_v51  ;;  %v747_v55 = vsel %vm2074_vm8, %v743_v51, %v745_v9  ;;  %1215 = vmatpush1.msk.msra.mxu1 %vm2075_vm9, %v758_v50 }
 0x33c   : > { %1216 = vmatprep.subr.msk.mxu1 %vm2076_vm10, %v747_v55 }
 0x33d   : > { %1217 = vmatpush1.msk.msra.mxu1 %vm468_vm11, %v746_v28  ;;  %vm2078_vm11 = vcmask 588800  }
 0x33e   : > { %v733_v58 = vpop.permute.xlu0 %732  ;;  %v729_v60 = vpop.permute.xlu1 %728 }
 0x33f   : > { %v735_v30 = vsel %vm453_vm3, %v731_v26, %v733_v58  ;;  %v734_v62 = vsel %vm453_vm3, %v729_v60, %v731_v26 }
 0x340   : > { %1218 = vmatprep.subr.msk.mxu1 %vm2077_vm12, %v735_v30 }
 0x341   : > { %1219 = vmatpush1.msk.msra.mxu1 %vm442_vm14, %v734_v62  ;;  %vm908_vm14 = vcmask 64512  }
 0x342   : > { %1220 = vmatprep.subr.msk.mxu1 %vm1833_vm2, %v1859_v4  ;;  %vm983_vm2 = vcmask 15360  }
 0x343   : > { %1221 = vmatpush1.msk.msra.mxu1 %vm1838_vm4, %v1862_v42 }
 0x344   : > { %1222 = vmatmul.mubr.msk.f32.vlgmr.msra.gmra.mxu1 %vm2078_vm11, %v391_v5  ;;  %1243 = vmatprep.subr.mxu1 %v1463_v8 }
 0x345   : > { %1245 = vmatprep.mubr.msk.f32.mxu1 %vm1464_vm13, %v1463_v8  ;;  %v396_v8 = vld [vmem:[%s2027_s8] sm:$0xff] }
 0x34b   : > { %v827_v12 = vpop.permute.xlu0 %826 }
 0x404   : > { %v898_v10 = vpop.f32.mrf.mxu1 }
 0x405   : > { %v899_v27 = vadd.f32 %v898_v10, %v827_v12 }
 0x406   : > { %v900_v14 = vpop.f32.mrf.mxu1 }
 0x407   : > { %v901_v32 = vadd.f32 %v900_v14, %v827_v12 }
 0x409   : > { %v903_v20 = vadd.f32 %v901_v32, %v899_v27 }
 0x40b   : > { %904 = vadd.xlane.f32.xlu1 %v903_v20 }
 0x494   : > { %v905_v29 = vpop.xlane.xlu1 %904 }
 0x495   : > { %v907_v33 = vmul.f32 0.00390625, %v905_v29 }
 0x497   : > { %1239 = vmatpush3.msra.mxu0 %v907_v33 }
 0x498   : > { %1241 = vmatmul.mubr.msk.f32.vlgmr.msra.gmra.mxu0 %vm908_vm14, %v394_v31 }
 0x558   : > { %v978_v35 = vpop.f32.mrf.mxu0 }
 0x559   : > { %v979_v36 = vadd.f32 %v978_v35, %v395_v34 }
 0x55a   : > { %v1242_v37 = vpop.f32.mrf.mxu0 }
 0x55b   : > { %v982_v38 = vmax.f32 %v979_v36, 0.0 }
 0x55d   : > { %1244 = vmatpush3.msk.msra.mxu1 %vm987_vm15, %v982_v38 }
 0x55e   : > { %1246 = vmatmul.mubr.msk.f32.vlgmr.msra.gmra.mxu1 %vm983_vm2, %v396_v8 }
 0x61e   : > { %v1057_v39 = vpop.f32.mrf.mxu1 }
 0x61f   : > { %v1058_v4 = vadd.f32 %v1057_v39, %v397_v7 }
 0x620   : > { %v1247_v42 = vpop.f32.mrf.mxu1 }
 0x621   : > { %v1226_v43 = vmul.f32 -1.442695, %v1058_v4 }
 0x623   : > { %1323 = vpow2.f32 %v1226_v43 }
 0x630   : > { %v1324_v47 = vpop.eup %1323 }
 0x631   : > { %v1064_v48 = vadd.f32 1.0, %v1324_v47 }
 0x633   : > { %1325 = vrcp.f32 %v1064_v48 }
 0x640   : > { %v1326_v49 = vpop.eup %1325 }
 0x641   : > { %1069 = vperm.xlu0 %1322, %v1326_v49  }
 0x6bc   : > { %v1070_v52 = vpop.permute.xlu0 %1069 }
 0x6bd   : > { %v1072_v53 = vmul.f32 %v1070_v52, %v899_v27  ;;  %v1073_v54 = vmul.f32 %v1070_v52, %v901_v32 }
 0x6bf   : > { %v1074_v56 = vadd.f32 %v1072_v53, %v1615_v0  ;;  %v1075_v57 = vadd.f32 %v1073_v54, %v1619_v1 }
 0x6c1   : > { %1076 = vst [vmem:[%s380_s21] sm:$0xff] %v1074_v56  ;;  %1077 = vst [vmem:[%s380_s21 + $0x8] sm:$0xff] %v1075_v57 }
 0x6c2   : > { %1392 = shalt.err (!%p1389_p3)
}
 0x6c3   : > { %s1393_s20 = scalar_lea.hbm %s1984_s27, 256  ;;  %s1397_s29 = scalar_lea.hbm %s2029_s10, 512 }
 0x6c4   : > { %p1394_p2 = scmp.ne.s32.totalorder %s1984_s27, %s1393_s20  ;;  %p1398_p7 = scmp.lt.s32.totalorder %s1984_s27, %s2029_s10 }
 0x6c5   : > { %p1399_p6 = scmp.lt.s32.totalorder %s1397_s29, %s1393_s20 }
 0x6c6   : > { %p1395_p4 = pnand %p1394_p2, %p1559_p5 }
 0x6c7   : > { %p1400_p9 = por %p1399_p6, %p1398_p7 }
 0x6c8   : > { %p1396_p13 = pneg %p1395_p4 }
 0x6ca   : > { %p1401_p10 = pnand %p1400_p9, %p1396_p13 }
 0x6cc   : > { %1404 = shalt.err (!%p1401_p10)
}
 0x6cd   : > { %1256 = dma.vmem_to_hbm [thread:$0]  (%p1559_p5), %s1094_s26, 256, %s1984_s27, %s1079_s28  }
 0x6ce PF: > { %p1273_p12 = scmp.ge.s32.totalorder %s1447_s16, 2  ;;  %s1105_s30 = sand.u32 1, %s1435_s13  }
 0x6cf   : > { %p2079_p8 = scmp.ne.s32.totalorder %s2046_s24, 0  ;;  %s1106_s25 = scalar_lea.sflag [#allocation5], %s1105_s30 }
 0x6d1   : > { %p1266_p11 = pnand %p1273_p12, %p2079_p8 }
 0x6d3   : > { %p1267_p0 = pneg %p1266_p11 }
 0x6d5   : > { %1430 = dma.done.wait (%p1267_p0), %s1106_s25, 256  }
 0x6d6   : > { %1432 = vsyncadd (%p1267_p0), %s1106_s25, 4294967040  ;;  %p22_p1 = scmp.ge.s32.totalorder %s1546_s19, 4   ;;  %s2080_s13 = smov %s1439_s14 }
 0x6d7   : > { %s2081_s14 = smov %s1443_s15  ;;  %s2082_s15 = smov %s1557_s22 }
 0x6d8   : > { %s2083_s16 = smov %s1546_s19  ;;  %24 = sbr.rel (!%p22_p1) target bundleno = 5 (0x5), region = 104 }
 0x6dd   :  { %1111 = vsyncpa [#allocation4], 1 }
 0x6de   :  { %1113 = vsyncpa [#allocation4 + $0x1], 1 }
 0x6df   :  { %1114 = vsyncpa [#allocation7], 1 }
 0x6e0   :  { %1115 = vsyncpa [#allocation5], 1 }
 0x6e1   :  { %1117 = vsyncpa [#allocation5 + $0x1], 1 }

</bundles_post_ra>
